<compile_context>
chip_gen: v5e
topology: v5e:2x2
jax: 0.10.0
libtpu: 0.0.40
codegen_flags: <defaults>
</compile_context>

<pallas_src>
import jax
import jax.numpy as jnp
from jax.experimental import pallas as pl
from jax.experimental.pallas import tpu as pltpu


def _twostage_kernel(feats_ref, mask_ref, w_att_ref, w_alpha_ref,
                     w_fc_ref, b_fc_ref, w_m1_ref, b_m1_ref,
                     w_m2_ref, b_m2_ref, loc_ref, attw_ref):
    # feats_ref: (Bb, A, D)   mask_ref: (Bb, A, 1)
    # w_att:(D,H) w_alpha:(1,H) w_fc:(D,D) b_fc:(1,D)
    # w_m1:(D,D) b_m1:(1,D) w_m2:(D,2) b_m2:(1,2)
    # loc_ref: (Bb, 2)   attw_ref: (Bb, A, 1)
    Bb, A, D = feats_ref.shape
    feats = feats_ref[...].astype(jnp.float32)                     # (Bb, A, D)

    # --- stage 1: attention logits: one MXU matmul over all Bb*A rows ---
    x2d = feats.reshape(Bb * A, D)                                 # layout-preserving collapse
    h = jnp.tanh(jnp.dot(x2d, w_att_ref[...],
                         preferred_element_type=jnp.float32))      # (Bb*A, H)
    # to_alpha is Linear(H, 1): VPU mul + lane reduce (no N=1 matmul)
    alpha = jnp.sum(h * w_alpha_ref[...], axis=-1, keepdims=True)  # (Bb*A, 1)
    alpha = alpha.reshape(Bb, A, 1)

    # --- masked, numerically-stable softmax over A ---
    alpha = jnp.where(mask_ref[...] == 0.0, -1e9, alpha)
    m = jnp.max(alpha, axis=1, keepdims=True)                      # (Bb, 1, 1)
    e = jnp.exp(alpha - m)
    s = jnp.sum(e, axis=1, keepdims=True)
    attw = e / s                                                   # (Bb, A, 1)
    attw_ref[...] = attw.astype(attw_ref.dtype)

    # --- attention-weighted sum over A ---
    att = jnp.sum(feats * attw, axis=1)                            # (Bb, D)

    # --- embedding fc + MLP regressor (all 2-D MXU matmuls) ---
    att = jnp.dot(att, w_fc_ref[...],
                  preferred_element_type=jnp.float32) + b_fc_ref[...]
    z = jnp.maximum(
        jnp.dot(att, w_m1_ref[...],
                preferred_element_type=jnp.float32) + b_m1_ref[...], 0.0)
    loc = jnp.maximum(
        jnp.dot(z, w_m2_ref[...],
                preferred_element_type=jnp.float32) + b_m2_ref[...], 0.0)
    loc_ref[...] = loc.astype(loc_ref.dtype)


def twostage_attention_loc_regressor(feats, vid_masks, params, *, batch_block=8):
    """feats: (B, A, D) or (B, W, H, D); vid_masks: (B, A) or None.

    params: PyTorch-layout weights:
      feat2att_w (H, D), to_alpha_w (1, H), fc_w (D, D), fc_b (D,),
      mlp1_w (D, D), mlp1_b (D,), mlp2_w (2, D), mlp2_b (2,)
    Returns (loc (B, 2), attw (B, A)).
    """
    if feats.ndim == 4:
        B, W, Hs, D = feats.shape
        feats = feats.reshape(B, W * Hs, D)
    B, A, D = feats.shape
    if vid_masks is None:
        vid_masks = jnp.ones((B, A), jnp.float32)
    mask3 = vid_masks.astype(jnp.float32).reshape(B, A, 1)

    # Pre-transpose PyTorch (out, in) weights once in the wrapper.
    w_att = params["feat2att_w"].T                    # (D, H)
    w_alpha = params["to_alpha_w"]                    # (1, H)
    w_fc = params["fc_w"].T                           # (D, D)
    b_fc = params["fc_b"].reshape(1, -1)              # (1, D)
    w_m1 = params["mlp1_w"].T                         # (D, D)
    b_m1 = params["mlp1_b"].reshape(1, -1)            # (1, D)
    w_m2 = params["mlp2_w"].T                         # (D, 2)
    b_m2 = params["mlp2_b"].reshape(1, -1)            # (1, 2)
    H = w_att.shape[1]

    Bb = min(B, batch_block)
    nb = pl.cdiv(B, Bb)

    loc, attw3 = pl.pallas_call(
        _twostage_kernel,
        out_shape=(jax.ShapeDtypeStruct((B, 2), feats.dtype),
                   jax.ShapeDtypeStruct((B, A, 1), feats.dtype)),
        grid_spec=pltpu.PrefetchScalarGridSpec(
            num_scalar_prefetch=0,
            grid=(nb,),
            in_specs=[
                pl.BlockSpec((Bb, A, D), lambda i: (i, 0, 0)),   # feats tile
                pl.BlockSpec((Bb, A, 1), lambda i: (i, 0, 0)),   # mask tile
                pl.BlockSpec((D, H), lambda i: (0, 0)),          # feat2att
                pl.BlockSpec((1, H), lambda i: (0, 0)),          # to_alpha
                pl.BlockSpec((D, D), lambda i: (0, 0)),          # fc W
                pl.BlockSpec((1, D), lambda i: (0, 0)),          # fc b
                pl.BlockSpec((D, D), lambda i: (0, 0)),          # mlp1 W
                pl.BlockSpec((1, D), lambda i: (0, 0)),          # mlp1 b
                pl.BlockSpec((D, 2), lambda i: (0, 0)),          # mlp2 W
                pl.BlockSpec((1, 2), lambda i: (0, 0)),          # mlp2 b
            ],
            out_specs=[
                pl.BlockSpec((Bb, 2), lambda i: (i, 0)),
                pl.BlockSpec((Bb, A, 1), lambda i: (i, 0, 0)),
            ],
        ),
        compiler_params=pltpu.CompilerParams(
            dimension_semantics=("parallel",)),
    )(feats, mask3, w_att, w_alpha, w_fc, b_fc, w_m1, b_m1, w_m2, b_m2)

    return loc, attw3[:, :, 0]


def _reference(feats, masks, params):
    # Pure-JAX mirror of the PyTorch forward.
    if feats.ndim == 4:
        B, W, Hs, D = feats.shape
        feats = feats.reshape(B, W * Hs, D)
    attn_f = feats @ params["feat2att_w"].T
    dot = jnp.tanh(attn_f)
    alpha = dot @ params["to_alpha_w"].T                        # (B, A, 1)
    if masks is not None:
        alpha = jnp.where(masks[:, :, None] == 0, -1e9, alpha)
    attw = jax.nn.softmax(jnp.transpose(alpha, (0, 2, 1)), axis=2)   # (B, 1, A)
    att_feats = (attw @ feats)[:, 0]                            # (B, D)
    attw = attw[:, 0]                                           # (B, A)
    att_feats = att_feats @ params["fc_w"].T + params["fc_b"]
    z = jnp.maximum(att_feats @ params["mlp1_w"].T + params["mlp1_b"], 0.0)
    loc = jnp.maximum(z @ params["mlp2_w"].T + params["mlp2_b"], 0.0)
    return loc, attw


if __name__ == "__main__":
    # cfg.MODEL.FUSION.EMB_DIM = 32 -> att_hid_dim = 16; B=2 clips, A=16 segments.
    B, A, D = 2, 16, 32
    H = D // 2

    key = jax.random.PRNGKey(0)
    ks = jax.random.split(key, 9)
    feats = jax.random.normal(ks[0], (B, A, D), jnp.float32)
    masks = jnp.ones((B, A), jnp.float32).at[1, 10:].set(0.0)   # ragged lengths

    params = {
        "feat2att_w": 0.2 * jax.random.normal(ks[1], (H, D), jnp.float32),
        "to_alpha_w": 0.2 * jax.random.normal(ks[2], (1, H), jnp.float32),
        "fc_w":       0.2 * jax.random.normal(ks[3], (D, D), jnp.float32),
        "fc_b":       0.1 * jax.random.normal(ks[4], (D,), jnp.float32),
        "mlp1_w":     0.2 * jax.random.normal(ks[5], (D, D), jnp.float32),
        "mlp1_b":     0.1 * jax.random.normal(ks[6], (D,), jnp.float32),
        "mlp2_w":     0.2 * jax.random.normal(ks[7], (2, D), jnp.float32),
        "mlp2_b":     0.1 * jax.random.normal(ks[8], (2,), jnp.float32),
    }

    loc, attw = twostage_attention_loc_regressor(feats, masks, params)
    loc, attw = jax.block_until_ready((loc, attw))

    loc_ref, attw_ref = _reference(feats, masks, params)
    assert loc.shape == (B, 2) and attw.shape == (B, A)
    assert jnp.allclose(jnp.sum(attw, axis=-1), 1.0, atol=1e-4)
    assert jnp.allclose(attw, attw_ref, atol=1e-4, rtol=1e-4), \
        float(jnp.max(jnp.abs(attw - attw_ref)))
    assert jnp.allclose(loc, loc_ref, atol=1e-4, rtol=1e-4), \
        float(jnp.max(jnp.abs(loc - loc_ref)))
    print("KERNEL_OK")
</pallas_src>

<mosaic_0001>
module attributes {stable_mosaic.version = 11 : i64} {
  func.func @_twostage_kernel(%arg0: i32, %arg1: memref<2x16x32xf32, #tpu.memory_space<vmem>>, %arg2: memref<2x16x1xf32, #tpu.memory_space<vmem>>, %arg3: memref<32x16xf32, #tpu.memory_space<vmem>>, %arg4: memref<1x16xf32, #tpu.memory_space<vmem>>, %arg5: memref<32x32xf32, #tpu.memory_space<vmem>>, %arg6: memref<1x32xf32, #tpu.memory_space<vmem>>, %arg7: memref<32x32xf32, #tpu.memory_space<vmem>>, %arg8: memref<1x32xf32, #tpu.memory_space<vmem>>, %arg9: memref<32x2xf32, #tpu.memory_space<vmem>>, %arg10: memref<1x2xf32, #tpu.memory_space<vmem>>, %arg11: memref<2x2xf32, #tpu.memory_space<vmem>>, %arg12: memref<2x16x1xf32, #tpu.memory_space<vmem>>) attributes {dimension_semantics = [#tpu.dimension_semantics<parallel>], iteration_bounds = array<i64: 1>, scalar_prefetch = 0 : i64, scratch_operands = 0 : i64, tpu.core_type = #tpu.core_type<tc>, window_params = [{transform_indices = @transform_0, window_bounds = array<i64: 2, 16, 32>}, {transform_indices = @transform_1, window_bounds = array<i64: 2, 16, 1>}, {pipeline_mode = #tpu.pipeline_mode<synchronous>, transform_indices = @transform_2, window_bounds = array<i64: 32, 16>}, {pipeline_mode = #tpu.pipeline_mode<synchronous>, transform_indices = @transform_3, window_bounds = array<i64: 1, 16>}, {pipeline_mode = #tpu.pipeline_mode<synchronous>, transform_indices = @transform_4, window_bounds = array<i64: 32, 32>}, {pipeline_mode = #tpu.pipeline_mode<synchronous>, transform_indices = @transform_5, window_bounds = array<i64: 1, 32>}, {pipeline_mode = #tpu.pipeline_mode<synchronous>, transform_indices = @transform_6, window_bounds = array<i64: 32, 32>}, {pipeline_mode = #tpu.pipeline_mode<synchronous>, transform_indices = @transform_7, window_bounds = array<i64: 1, 32>}, {pipeline_mode = #tpu.pipeline_mode<synchronous>, transform_indices = @transform_8, window_bounds = array<i64: 32, 2>}, {pipeline_mode = #tpu.pipeline_mode<synchronous>, transform_indices = @transform_9, window_bounds = array<i64: 1, 2>}, {transform_indices = @transform_10, window_bounds = array<i64: 2, 2>}, {transform_indices = @transform_11, window_bounds = array<i64: 2, 16, 1>}]} {
    %c0 = arith.constant 0 : index
    %c0_0 = arith.constant 0 : index
    %c0_1 = arith.constant 0 : index
    %0 = vector.load %arg1[%c0, %c0_0, %c0_1] : memref<2x16x32xf32, #tpu.memory_space<vmem>>, vector<2x16x32xf32>
    %1 = vector.shape_cast %0 : vector<2x16x32xf32> to vector<32x32xf32>
    %c0_2 = arith.constant 0 : index
    %c0_3 = arith.constant 0 : index
    %2 = vector.load %arg3[%c0_2, %c0_3] : memref<32x16xf32, #tpu.memory_space<vmem>>, vector<32x16xf32>
    %cst = arith.constant dense<0.000000e+00> : vector<32x16xf32>
    %3 = tpu.matmul %1, %2, %cst {dimension_numbers = #tpu.dot_dimension_numbers<[1], [0], [0], [1], [0, 0, 1, 1], [], []>} : vector<32x32xf32>, vector<32x16xf32>, vector<32x16xf32> -> vector<32x16xf32>
    %4 = math.tanh %3 : vector<32x16xf32>
    %c0_4 = arith.constant 0 : index
    %c0_5 = arith.constant 0 : index
    %5 = vector.load %arg4[%c0_4, %c0_5] : memref<1x16xf32, #tpu.memory_space<vmem>>, vector<1x16xf32>
    %6 = vector.broadcast %5 : vector<1x16xf32> to vector<32x16xf32>
    %7 = arith.mulf %4, %6 : vector<32x16xf32>
    %cst_6 = arith.constant dense<0.000000e+00> : vector<32xf32>
    %8 = vector.multi_reduction <add>, %7, %cst_6 [1] : vector<32x16xf32> to vector<32xf32>
    %9 = vector.shape_cast %8 : vector<32xf32> to vector<32x1xf32>
    %10 = vector.shape_cast %9 : vector<32x1xf32> to vector<2x16x1xf32>
    %c0_7 = arith.constant 0 : index
    %c0_8 = arith.constant 0 : index
    %c0_9 = arith.constant 0 : index
    %11 = vector.load %arg2[%c0_7, %c0_8, %c0_9] : memref<2x16x1xf32, #tpu.memory_space<vmem>>, vector<2x16x1xf32>
    %cst_10 = arith.constant 0.000000e+00 : f32
    %12 = vector.broadcast %cst_10 : f32 to vector<2x16x1xf32>
    %13 = arith.cmpf oeq, %11, %12 : vector<2x16x1xf32>
    %cst_11 = arith.constant -1.000000e+09 : f32
    %14 = vector.broadcast %cst_11 : f32 to vector<2x16x1xf32>
    %15 = arith.select %13, %14, %10 : vector<2x16x1xi1>, vector<2x16x1xf32>
    %cst_12 = arith.constant dense<0xFF800000> : vector<2x1xf32>
    %16 = vector.multi_reduction <maximumf>, %15, %cst_12 [1] : vector<2x16x1xf32> to vector<2x1xf32>
    %17 = vector.shape_cast %16 : vector<2x1xf32> to vector<2x1x1xf32>
    %18 = vector.broadcast %17 : vector<2x1x1xf32> to vector<2x16x1xf32>
    %19 = arith.subf %15, %18 : vector<2x16x1xf32>
    %20 = math.exp %19 : vector<2x16x1xf32>
    %cst_13 = arith.constant dense<0.000000e+00> : vector<2x1xf32>
    %21 = vector.multi_reduction <add>, %20, %cst_13 [1] : vector<2x16x1xf32> to vector<2x1xf32>
    %22 = vector.shape_cast %21 : vector<2x1xf32> to vector<2x1x1xf32>
    %23 = vector.broadcast %22 : vector<2x1x1xf32> to vector<2x16x1xf32>
    %24 = arith.divf %20, %23 : vector<2x16x1xf32>
    %c0_14 = arith.constant 0 : index
    %c0_15 = arith.constant 0 : index
    %c0_16 = arith.constant 0 : index
    %25 = vector.load %arg12[%c0_14, %c0_15, %c0_16] : memref<2x16x1xf32, #tpu.memory_space<vmem>>, vector<2x16x1xf32>
    tpu.vector_store %arg12[%c0_14, %c0_15, %c0_16], %24 {strides = array<i32>} : memref<2x16x1xf32, #tpu.memory_space<vmem>>, vector<2x16x1xf32>,
    %26 = vector.broadcast %24 : vector<2x16x1xf32> to vector<2x16x32xf32>
    %27 = arith.mulf %0, %26 : vector<2x16x32xf32>
    %cst_17 = arith.constant dense<0.000000e+00> : vector<2x32xf32>
    %28 = vector.multi_reduction <add>, %27, %cst_17 [1] : vector<2x16x32xf32> to vector<2x32xf32>
    %c0_18 = arith.constant 0 : index
    %c0_19 = arith.constant 0 : index
    %29 = vector.load %arg5[%c0_18, %c0_19] : memref<32x32xf32, #tpu.memory_space<vmem>>, vector<32x32xf32>
    %cst_20 = arith.constant dense<0.000000e+00> : vector<2x32xf32>
    %30 = tpu.matmul %28, %29, %cst_20 {dimension_numbers = #tpu.dot_dimension_numbers<[1], [0], [0], [1], [0, 0, 1, 1], [], []>} : vector<2x32xf32>, vector<32x32xf32>, vector<2x32xf32> -> vector<2x32xf32>
    %c0_21 = arith.constant 0 : index
    %c0_22 = arith.constant 0 : index
    %31 = vector.load %arg6[%c0_21, %c0_22] : memref<1x32xf32, #tpu.memory_space<vmem>>, vector<1x32xf32>
    %32 = vector.broadcast %31 : vector<1x32xf32> to vector<2x32xf32>
    %33 = arith.addf %30, %32 : vector<2x32xf32>
    %c0_23 = arith.constant 0 : index
    %c0_24 = arith.constant 0 : index
    %34 = vector.load %arg7[%c0_23, %c0_24] : memref<32x32xf32, #tpu.memory_space<vmem>>, vector<32x32xf32>
    %cst_25 = arith.constant dense<0.000000e+00> : vector<2x32xf32>
    %35 = tpu.matmul %33, %34, %cst_25 {dimension_numbers = #tpu.dot_dimension_numbers<[1], [0], [0], [1], [0, 0, 1, 1], [], []>} : vector<2x32xf32>, vector<32x32xf32>, vector<2x32xf32> -> vector<2x32xf32>
    %c0_26 = arith.constant 0 : index
    %c0_27 = arith.constant 0 : index
    %36 = vector.load %arg8[%c0_26, %c0_27] : memref<1x32xf32, #tpu.memory_space<vmem>>, vector<1x32xf32>
    %37 = vector.broadcast %36 : vector<1x32xf32> to vector<2x32xf32>
    %38 = arith.addf %35, %37 : vector<2x32xf32>
    %cst_28 = arith.constant 0.000000e+00 : f32
    %39 = vector.broadcast %cst_28 : f32 to vector<2x32xf32>
    %40 = arith.maximumf %38, %39 : vector<2x32xf32>
    %c0_29 = arith.constant 0 : index
    %c0_30 = arith.constant 0 : index
    %41 = vector.load %arg9[%c0_29, %c0_30] : memref<32x2xf32, #tpu.memory_space<vmem>>, vector<32x2xf32>
    %cst_31 = arith.constant dense<0.000000e+00> : vector<2x2xf32>
    %42 = tpu.matmul %40, %41, %cst_31 {dimension_numbers = #tpu.dot_dimension_numbers<[1], [0], [0], [1], [0, 0, 1, 1], [], []>} : vector<2x32xf32>, vector<32x2xf32>, vector<2x2xf32> -> vector<2x2xf32>
    %c0_32 = arith.constant 0 : index
    %c0_33 = arith.constant 0 : index
    %43 = vector.load %arg10[%c0_32, %c0_33] : memref<1x2xf32, #tpu.memory_space<vmem>>, vector<1x2xf32>
    %44 = vector.broadcast %43 : vector<1x2xf32> to vector<2x2xf32>
    %45 = arith.addf %42, %44 : vector<2x2xf32>
    %cst_34 = arith.constant 0.000000e+00 : f32
    %46 = vector.broadcast %cst_34 : f32 to vector<2x2xf32>
    %47 = arith.maximumf %45, %46 : vector<2x2xf32>
    %c0_35 = arith.constant 0 : index
    %c0_36 = arith.constant 0 : index
    %48 = vector.load %arg11[%c0_35, %c0_36] : memref<2x2xf32, #tpu.memory_space<vmem>>, vector<2x2xf32>
    tpu.vector_store %arg11[%c0_35, %c0_36], %47 {strides = array<i32>} : memref<2x2xf32, #tpu.memory_space<vmem>>, vector<2x2xf32>,
    return
  }
  func.func @transform_0(%arg0: i32) -> (i32, i32, i32) {
    %c0_i32 = arith.constant 0 : i32
    %c0_i32_0 = arith.constant 0 : i32
    %c0_i32_1 = arith.constant 0 : i32
    return %arg0, %c0_i32, %c0_i32_0 : i32, i32, i32
  }
  func.func @transform_1(%arg0: i32) -> (i32, i32, i32) {
    %c0_i32 = arith.constant 0 : i32
    %c0_i32_0 = arith.constant 0 : i32
    %c0_i32_1 = arith.constant 0 : i32
    return %arg0, %c0_i32, %c0_i32_0 : i32, i32, i32
  }
  func.func @transform_2(%arg0: i32) -> (i32, i32) {
    %c0_i32 = arith.constant 0 : i32
    %c0_i32_0 = arith.constant 0 : i32
    %c0_i32_1 = arith.constant 0 : i32
    return %c0_i32, %c0_i32_0 : i32, i32
  }
  func.func @transform_3(%arg0: i32) -> (i32, i32) {
    %c0_i32 = arith.constant 0 : i32
    %c0_i32_0 = arith.constant 0 : i32
    %c0_i32_1 = arith.constant 0 : i32
    return %c0_i32, %c0_i32_0 : i32, i32
  }
  func.func @transform_4(%arg0: i32) -> (i32, i32) {
    %c0_i32 = arith.constant 0 : i32
    %c0_i32_0 = arith.constant 0 : i32
    %c0_i32_1 = arith.constant 0 : i32
    return %c0_i32, %c0_i32_0 : i32, i32
  }
  func.func @transform_5(%arg0: i32) -> (i32, i32) {
    %c0_i32 = arith.constant 0 : i32
    %c0_i32_0 = arith.constant 0 : i32
    %c0_i32_1 = arith.constant 0 : i32
    return %c0_i32, %c0_i32_0 : i32, i32
  }
  func.func @transform_6(%arg0: i32) -> (i32, i32) {
    %c0_i32 = arith.constant 0 : i32
    %c0_i32_0 = arith.constant 0 : i32
    %c0_i32_1 = arith.constant 0 : i32
    return %c0_i32, %c0_i32_0 : i32, i32
  }
  func.func @transform_7(%arg0: i32) -> (i32, i32) {
    %c0_i32 = arith.constant 0 : i32
    %c0_i32_0 = arith.constant 0 : i32
    %c0_i32_1 = arith.constant 0 : i32
    return %c0_i32, %c0_i32_0 : i32, i32
  }
  func.func @transform_8(%arg0: i32) -> (i32, i32) {
    %c0_i32 = arith.constant 0 : i32
    %c0_i32_0 = arith.constant 0 : i32
    %c0_i32_1 = arith.constant 0 : i32
    return %c0_i32, %c0_i32_0 : i32, i32
  }
  func.func @transform_9(%arg0: i32) -> (i32, i32) {
    %c0_i32 = arith.constant 0 : i32
    %c0_i32_0 = arith.constant 0 : i32
    %c0_i32_1 = arith.constant 0 : i32
    return %c0_i32, %c0_i32_0 : i32, i32
  }
  func.func @transform_10(%arg0: i32) -> (i32, i32) {
    %c0_i32 = arith.constant 0 : i32
    %c0_i32_0 = arith.constant 0 : i32
    return %arg0, %c0_i32 : i32, i32
  }
  func.func @transform_11(%arg0: i32) -> (i32, i32, i32) {
    %c0_i32 = arith.constant 0 : i32
    %c0_i32_0 = arith.constant 0 : i32
    %c0_i32_1 = arith.constant 0 : i32
    return %arg0, %c0_i32, %c0_i32_0 : i32, i32, i32
  }
}

</mosaic_0001>

<bundles_post_ra>
// kernel: tpu_custom_call.1
= control target key start
LH: loop header
LB: loop body
LE: loop exit
PB: predicated region body
PF: predicated region fallthrough
CT: control target
= control target key end

     0   :  { %s646_s0 = inlined_call_operand.vmem [shape: f32[2,16,32], index: 0, kind: input, shape index: {}]   ;;  %s647_s1 = inlined_call_operand.vmem [shape: f32[2,16,1], index: 1, kind: input, shape index: {}]   ;;  %s648_s2 = inlined_call_operand.vmem [shape: f32[32,16], index: 2, kind: input, shape index: {}]   ;;  %s649_s3 = inlined_call_operand.vmem [shape: f32[1,16], index: 3, kind: input, shape index: {}]   ;;  %s650_s4 = inlined_call_operand.vmem [shape: f32[32,32], index: 4, kind: input, shape index: {}]   ;;  %s651_s5 = inlined_call_operand.vmem [shape: f32[1,32], index: 5, kind: input, shape index: {}]   ;;  %s652_s6 = inlined_call_operand.vmem [shape: f32[32,32], index: 6, kind: input, shape index: {}]   ;;  %s653_s7 = inlined_call_operand.vmem [shape: f32[1,32], index: 7, kind: input, shape index: {}]   ;;  %s654_s8 = inlined_call_operand.vmem [shape: f32[32,2], index: 8, kind: input, shape index: {}]   ;;  %s655_s9 = inlined_call_operand.vmem [shape: f32[1,2], index: 9, kind: input, shape index: {}]   ;;  %s656_s10 = inlined_call_operand.hbm [shape: f32[2,2], index: 10, kind: output, shape index: {0}]   ;;  %s657_s11 = inlined_call_operand.vmem [shape: f32[2,16,1], index: 11, kind: output, shape index: {1}]  }
   0x1   :  { %v45_v0 = vld [vmem:[%s648_s2 + $0x18] sm:$0xff]  ;;  %v44_v1 = vld [vmem:[%s648_s2 + $0x10] sm:$0xff]  ;;  %v43_v2 = vld [vmem:[%s648_s2 + $0x8] sm:$0xff] }
   0x2   :  { %71 = vmatpush.msra.mxu0 %v45_v0  ;;  %379 = vmatpush.msra.mxu1 %v45_v0  ;;  %v42_v3 = vld [vmem:[%s648_s2] sm:$0xff] }
   0x3   :  { %380 = vmatpush.msra.mxu2 %v45_v0 }
   0x4   :  { %72 = vmatpush.msra.mxu0 %v44_v1  ;;  %381 = vmatpush.msra.mxu1 %v44_v1 }
   0x5   :  { %382 = vmatpush.msra.mxu2 %v44_v1 }
   0x6   :  { %17 = vsyncpa [#allocation3], 0  ;;  %73 = vmatpush.msra.mxu0 %v43_v2  ;;  %383 = vmatpush.msra.mxu1 %v43_v2  ;;  %v519_v4 = vld [vmem:[%s646_s0] sm:$0xff]  ;;  %vm46_vm0 = vcmask 261120   ;;  %v524_v5 = vld [vmem:[%s646_s0 + $0x10] sm:$0xff]  ;;  %vm100_vm1 = vcmask 130048  }
   0x7   :  { %384 = vmatpush.msra.mxu2 %v43_v2  ;;  %v529_v6 = vld [vmem:[%s646_s0 + $0x18] sm:$0xff]  ;;  %v540_v7 = vld [vmem:[%s646_s0 + $0x8] sm:$0xff]  ;;  %v392_v10 = vld [vmem:[%s649_s3] ss:$0 sm:$0xff]  ;;  %vm125_vm5 = vcmask 7168   ;;  %v442_v54 = vmov 0  }
   0x8   :  { %74 = vmatpush.msra.mxu0 %v42_v3  ;;  %385 = vmatpush.msra.mxu1 %v42_v3  ;;  %v113_v25 = vld [vmem:[%s647_s1] sm:$0xff]  ;;  %v115_v28 = vld [vmem:[%s647_s1 + $0x10] sm:$0xff]  ;;  %v114_v29 = vld [vmem:[%s647_s1 + $0x8] sm:$0xff]  ;;  %vm262_vm15 = vcmask 1041409   ;;  %s443_s2 = smov [#allocation2]  }
   0x9   :  { %372 = vmatmul.msk.f32.vlgmr.msra.gmra.mxu0 %vm46_vm0, %v519_v4  ;;  %374 = vmatmul.msk.f32.vlgmr.msra.gmra.mxu1 %vm46_vm0, %v524_v5  ;;  %vm117_vm2 = vcmp.eq.f32.partialorder %v113_v25, 0.0  ;;  %v116_v30 = vld [vmem:[%s647_s1 + $0x18] sm:$0xff]  ;;  %vm119_vm3 = vcmp.eq.f32.partialorder %v115_v28, 0.0  ;;  %vm118_vm4 = vcmp.eq.f32.partialorder %v114_v29, 0.0  ;;  %s357_s12 = sshll.u32 %s443_s2, 4  ;;  %s358_s12 = int_to_ptr.vmem [resolvable:$true] %s357_s12 }
   0xa   :  { %386 = vmatpush.msra.mxu2 %v42_v3  ;;  %vm120_vm6 = vcmp.eq.f32.partialorder %v116_v30, 0.0  ;;  %391 = vset.pattern.permute.xlu1 %v442_v54 }
   0xb   :  { %375 = vmatmul.msk.f32.vlgmr.msra.gmra.mxu2 %vm46_vm0, %v529_v6  ;;  %390 = vset.pattern.permute.xlu0 %v442_v54 }
   0xc   :  { %389 = vset.pattern.permute.xlu2 %v442_v54 }
  0x11   :  { %373 = vmatmul.msk.f32.gmra.mxu0 %vm46_vm0, %v540_v7 }
  0x86   :  { %v76_v8 = vpop.f32.mrf.mxu0  ;;  %v82_v9 = vpop.f32.mrf.mxu1 }
  0x87   :  { %396 = vtanh.f32 %v76_v8 }
  0x88   :  { %398 = vtanh.f32 %v82_v9 }
  0x8d   :  { %v397_v11 = vpop.eup %396 }
  0x8e   :  { %v399_v12 = vpop.eup %398  ;;  %v79_v13 = vpop.f32.mrf.mxu0  ;;  %v96_v15 = vmul.f32 %v397_v11, %v392_v10 }
  0x8f   :  { %v85_v14 = vpop.f32.mrf.mxu2  ;;  %400 = vtanh.f32 %v79_v13  ;;  %v98_v16 = vmul.f32 %v399_v12, %v392_v10 }
  0x90   :  { %402 = vtanh.f32 %v85_v14  ;;  %v101_v17 = vsel %vm100_vm1, %v96_v15, 0.0 }
  0x91   :  { %v107_v18 = vsel %vm100_vm1, %v98_v16, 0.0  ;;  %102 = vadd.xlane.f32.xlu0 %v101_v17 }
  0x92   :  { %108 = vadd.xlane.f32.xlu1 %v107_v18 }
  0x95   :  { %v401_v19 = vpop.eup %400 }
  0x96   :  { %v403_v20 = vpop.eup %402  ;;  %v97_v21 = vmul.f32 %v401_v19, %v392_v10 }
  0x97   :  { %v99_v22 = vmul.f32 %v403_v20, %v392_v10 }
  0x98   :  { %v104_v23 = vsel %vm100_vm1, %v97_v21, 0.0 }
  0x99   :  { %v110_v24 = vsel %vm100_vm1, %v99_v22, 0.0  ;;  %105 = vadd.xlane.f32.xlu0 %v104_v23  ;;  %vm350_vm1 = vcmask 9216  }
  0x9a   :  { %111 = vadd.xlane.f32.xlu1 %v110_v24 }
 0x104   :  { %v103_v26 = vpop.xlane.xlu0 %102 }
 0x105   :  { %v109_v27 = vpop.xlane.xlu1 %108  ;;  %v121_v31 = vsel %vm117_vm2, -1e+09, %v103_v26 }
 0x106   :  { %v123_v32 = vsel %vm119_vm3, -1e+09, %v109_v27  ;;  %v126_v33 = vsel %vm125_vm5, %v121_v31, -inf }
 0x107   :  { %v135_v39 = vsel %vm125_vm5, %v123_v32, -inf }
 0x10c   :  { %v106_v34 = vpop.xlane.xlu0 %105 }
 0x10d   :  { %v112_v35 = vpop.xlane.xlu1 %111  ;;  %v122_v36 = vsel %vm118_vm4, -1e+09, %v106_v34 }
 0x10e   :  { %v124_v37 = vsel %vm120_vm6, -1e+09, %v112_v35  ;;  %v127_v38 = vsel %vm125_vm5, %v122_v36, -inf }
 0x10f   :  { %v136_v40 = vsel %vm125_vm5, %v124_v37, -inf  ;;  %v128_v41 = vmax.f32 %v126_v33, %v127_v38 }
 0x110   :  { %v137_v42 = vmax.f32 %v135_v39, %v136_v40 }
 0x111   :  { %v129_v43 = vrot.slane %v128_v41, 4 }
 0x112   :  { %v138_v44 = vrot.slane %v137_v42, 4 }
 0x113   :  { %v130_v45 = vmax.f32 %v128_v41, %v129_v43 }
 0x114   :  { %v139_v46 = vmax.f32 %v137_v42, %v138_v44 }
 0x115   :  { %v131_v47 = vrot.slane %v130_v45, 2 }
 0x116   :  { %v140_v48 = vrot.slane %v139_v46, 2 }
 0x117   :  { %v132_v49 = vmax.f32 %v130_v45, %v131_v47 }
 0x118   :  { %v141_v50 = vmax.f32 %v139_v46, %v140_v48 }
 0x119   :  { %v133_v51 = vrot.slane %v132_v49, 1 }
 0x11a   :  { %v142_v52 = vrot.slane %v141_v50, 1 }
 0x11b   :  { %v134_v53 = vmax.f32 %v132_v49, %v133_v51  ;;  %v255_v51 = vld [vmem:[%s650_s4 + $0x18] sm:$0xff] }
 0x11c   :  { %v143_v55 = vmax.f32 %v141_v50, %v142_v52  ;;  %v254_v52 = vld [vmem:[%s650_s4 + $0x10] sm:$0xff]  ;;  %278 = vmatpush.msrb.mxu1 %v255_v51 }
 0x11d   :  { %v144_v56 = vsub.f32 %v121_v31, %v134_v53  ;;  %v145_v57 = vsub.f32 %v122_v36, %v134_v53  ;;  %v253_v53 = vld [vmem:[%s650_s4 + $0x8] sm:$0xff] }
 0x11e   :  { %v146_v58 = vsub.f32 %v123_v32, %v143_v55  ;;  %v147_v59 = vsub.f32 %v124_v37, %v143_v55  ;;  %279 = vmatpush.msrb.mxu1 %v254_v52 }
 0x11f   :  { %v148_v60 = vmul.f32 1.442695, %v144_v56  ;;  %v150_v63 = vmul.f32 1.442695, %v145_v57  ;;  %v252_v56 = vld [vmem:[%s650_s4] sm:$0xff] }
 0x120   :  { %v152_v61 = vmul.f32 1.442695, %v146_v58  ;;  %v154_v62 = vmul.f32 1.442695, %v147_v59  ;;  %280 = vmatpush.msrb.mxu1 %v253_v53  ;;  %v289_v58 = vld [vmem:[%s652_s6 + $0x18] sm:$0xff]  ;;  %v288_v59 = vld [vmem:[%s652_s6 + $0x10] sm:$0xff] }
 0x121   :  { %404 = vpow2.f32 %v148_v60  ;;  %309 = vmatpush.msrb.mxu2 %v289_v58 }
 0x122   :  { %406 = vpow2.f32 %v152_v61  ;;  %281 = vmatpush.msrb.mxu1 %v252_v56 }
 0x123   :  { %408 = vpow2.f32 %v154_v62  ;;  %310 = vmatpush.msrb.mxu2 %v288_v59 }
 0x124   :  { %410 = vpow2.f32 %v150_v63 }
 0x127   :  { %v405_v0 = vpop.eup %404 }
 0x128   :  { %v407_v1 = vpop.eup %406  ;;  %v156_v8 = vsel %vm125_vm5, %v405_v0, 0.0 }
 0x129   :  { %v409_v2 = vpop.eup %408  ;;  %v165_v3 = vsel %vm125_vm5, %v407_v1, 0.0 }
 0x12a   :  { %v411_v9 = vpop.eup %410  ;;  %v166_v10 = vsel %vm125_vm5, %v409_v2, 0.0 }
 0x12b   :  { %v167_v11 = vadd.f32 %v166_v10, %v165_v3  ;;  %v157_v12 = vsel %vm125_vm5, %v411_v9, 0.0 }
 0x12c   :  { %v158_v13 = vadd.f32 %v157_v12, %v156_v8 }
 0x12d   :  { %v168_v14 = vrot.slane %v167_v11, 4 }
 0x12e   :  { %v159_v15 = vrot.slane %v158_v13, 4 }
 0x12f   :  { %v169_v16 = vadd.f32 %v168_v14, %v167_v11 }
 0x130   :  { %v160_v17 = vadd.f32 %v159_v15, %v158_v13 }
 0x131   :  { %v170_v18 = vrot.slane %v169_v16, 2 }
 0x132   :  { %v161_v19 = vrot.slane %v160_v17, 2 }
 0x133   :  { %v171_v20 = vadd.f32 %v170_v18, %v169_v16 }
 0x134   :  { %v162_v21 = vadd.f32 %v161_v19, %v160_v17 }
 0x135   :  { %v172_v22 = vrot.slane %v171_v20, 1 }
 0x136   :  { %v163_v23 = vrot.slane %v162_v21, 1 }
 0x137   :  { %v173_v24 = vadd.f32 %v172_v22, %v171_v20  ;;  %v393_v22 = vld [vmem:[%s651_s5] ss:$0 sm:$0xff] }
 0x138   :  { %v164_v25 = vadd.f32 %v163_v23, %v162_v21 }
 0x139   :  { %412 = vrcp.f32 %v173_v24  ;;  %v201_v31 = vand.u32 2147483648, %v173_v24  ;;  %v199_v34 = vand.u32 2147483647, %v173_v24  ;;  %vm195_vm9 = vweird.f32 %v173_v24 }
 0x13a   :  { %414 = vrcp.f32 %v164_v25  ;;  %v185_v35 = vand.u32 2147483648, %v164_v25  ;;  %v183_v37 = vand.u32 2147483647, %v164_v25  ;;  %vm179_vm11 = vweird.f32 %v164_v25 }
 0x13b   :  { %v202_v39 = vor.u32 1.1754944e-38, %v201_v31  ;;  %vm200_vm12 = vcmp.eq.f32.partialorder %v199_v34, 8.507059e+37 }
 0x13c   :  { %v186_v42 = vor.u32 1.1754944e-38, %v185_v35  ;;  %vm184_vm14 = vcmp.eq.f32.partialorder %v183_v37, 8.507059e+37 }
 0x13f   :  { %v413_v26 = vpop.eup %412 }
 0x140   :  { %v415_v27 = vpop.eup %414  ;;  %v191_v28 = vmul.f32 %v413_v26, %v173_v24  ;;  %vm196_vm7 = vweird.f32 %v413_v26 }
 0x141   :  { %v175_v29 = vmul.f32 %v415_v27, %v164_v25  ;;  %vm180_vm8 = vweird.f32 %v415_v27  ;;  %vm197_vm10 = vmor %vm195_vm9, %vm196_vm7  ;;  %v320_v25 = vld [vmem:[%s654_s8 + $0x10] sm:$0xff] }
 0x142   :  { %v192_v30 = vsub.f32 1.0, %v191_v28  ;;  %vm181_vm13 = vmor %vm179_vm11, %vm180_vm8  ;;  %v394_v28 = vld [vmem:[%s653_s7] ss:$0 sm:$0xff] }
 0x143   :  { %v176_v32 = vsub.f32 1.0, %v175_v29 }
 0x144   :  { %v193_v33 = vmul.f32 %v413_v26, %v192_v30 }
 0x145   :  { %v177_v36 = vmul.f32 %v415_v27, %v176_v32  ;;  %v395_v32 = vld [vmem:[%s655_s9] ss:$0 sm:$0xff] }
 0x146   :  { %v194_v38 = vadd.f32 %v413_v26, %v193_v33 }
 0x147   :  { %v178_v40 = vadd.f32 %v415_v27, %v177_v36 }
 0x148   :  { %v198_v41 = vsel %vm197_vm10, %v413_v26, %v194_v38  ;;  %v319_v26 = vld [vmem:[%s654_s8 + $0x8] sm:$0xff] }
 0x149   :  { %v203_v43 = vsel %vm200_vm12, %v202_v39, %v198_v41  ;;  %v182_v44 = vsel %vm181_vm13, %v415_v27, %v178_v40  ;;  %v318_v27 = vld [vmem:[%s654_s8] sm:$0xff] }
 0x14a   :  { %v205_v45 = vmul.f32 %v409_v2, %v203_v43  ;;  %v204_v46 = vmul.f32 %v407_v1, %v203_v43  ;;  %v187_v47 = vsel %vm184_vm14, %v186_v42, %v182_v44 }
 0x14b   :  { %v188_v48 = vmul.f32 %v405_v0, %v187_v47  ;;  %v189_v49 = vmul.f32 %v411_v9, %v187_v47 }
 0x14c   :  { %227 = vperm.xlu1 %391, %v205_v45   ;;  %209 = vst.msk [vmem:[%s657_s11 + $0x18] sm:$0xff] %vm125_vm5, %v205_v45  ;;  %222 = vperm.xlu0 %390, %v204_v46  }
 0x14d   :  { %208 = vst.msk [vmem:[%s657_s11 + $0x10] sm:$0xff] %vm125_vm5, %v204_v46  ;;  %212 = vperm.xlu2 %389, %v188_v48  }
 0x14e   :  { %207 = vst.msk [vmem:[%s657_s11 + $0x8] sm:$0xff] %vm125_vm5, %v189_v49 }
 0x14f   :  { %206 = vst.msk [vmem:[%s657_s11] sm:$0xff] %vm125_vm5, %v188_v48  ;;  %s359_s11 = sshll.u32 %s656_s10, 4  ;;  %s360_s11 = int_to_ptr.hbm [resolvable:$true] %s359_s11 }
 0x155   :  { %217 = vperm.xlu2 %389, %v189_v49  }
 0x1a7   :  { %v213_v50 = vpop.permute.xlu2 %212 }
 0x1a8   :  { %v230_v57 = vmul.f32 %v213_v50, %v519_v4 }
 0x1aa   :  { %v234_v4 = vsel %vm46_vm0, %v230_v57, 0.0 }
 0x1af   :  { %v218_v54 = vpop.permute.xlu2 %217 }
 0x1b0   :  { %v231_v55 = vmul.f32 %v218_v54, %v540_v7  ;;  %v287_v7 = vld [vmem:[%s652_s6 + $0x8] sm:$0xff] }
 0x1b1   :  { %311 = vmatpush.msrb.mxu2 %v287_v7 }
 0x1b2   :  { %v235_v60 = vsel %vm46_vm0, %v231_v55, 0.0 }
 0x1b3   :  { %v236_v61 = vadd.f32 %v235_v60, %v234_v4 }
 0x1b5   :  { %v237_v62 = vrot.slane %v236_v61, 4 }
 0x1b7   :  { %v238_v63 = vadd.f32 %v237_v62, %v236_v61 }
 0x1b9   :  { %v239_v10 = vrot.slane %v238_v63, 2 }
 0x1bb   :  { %v240_v13 = vadd.f32 %v239_v10, %v238_v63 }
 0x1bd   :  { %v241_v16 = vrot.slane %v240_v13, 1 }
 0x1be   :  { %v228_v0 = vpop.permute.xlu1 %227  ;;  %v223_v1 = vpop.permute.xlu0 %222 }
 0x1bf   :  { %v233_v2 = vmul.f32 %v228_v0, %v529_v6  ;;  %v232_v3 = vmul.f32 %v223_v1, %v524_v5  ;;  %v242_v19 = vadd.f32 %v241_v16, %v240_v13  ;;  %v286_v5 = vld [vmem:[%s652_s6] sm:$0xff]  ;;  %v321_v6 = vld [vmem:[%s654_s8 + $0x18] sm:$0xff] }
 0x1c0   :  { %312 = vmatpush.msrb.mxu2 %v286_v5  ;;  %341 = vmatpush.msra.mxu3 %v321_v6 }
 0x1c1   :  { %v244_v8 = vsel %vm46_vm0, %v233_v2, 0.0  ;;  %v243_v9 = vsel %vm46_vm0, %v232_v3, 0.0 }
 0x1c2   :  { %v245_v11 = vadd.f32 %v244_v8, %v243_v9  ;;  %342 = vmatpush.msra.mxu3 %v320_v25 }
 0x1c4   :  { %v246_v12 = vrot.slane %v245_v11, 4  ;;  %343 = vmatpush.msra.mxu3 %v319_v26 }
 0x1c6   :  { %v247_v14 = vadd.f32 %v246_v12, %v245_v11  ;;  %344 = vmatpush.msra.mxu3 %v318_v27 }
 0x1c8   :  { %v248_v15 = vrot.slane %v247_v14, 2 }
 0x1ca   :  { %v249_v17 = vadd.f32 %v248_v15, %v247_v14 }
 0x1cc   :  { %v250_v18 = vrot.slane %v249_v17, 1 }
 0x1ce   :  { %v251_v20 = vadd.f32 %v250_v18, %v249_v17 }
 0x1d0   :  { %v263_v21 = vsel %vm262_vm15, %v251_v20, %v242_v19 }
 0x1d1   :  { %376 = vmatmul.msk.f32.vlgmr.msrb.gmra.mxu1 %vm46_vm0, %v263_v21 }
 0x24e   :  { %v283_v23 = vpop.f32.mrf.mxu1 }
 0x24f   :  { %v284_v24 = vadd.f32 %v393_v22, %v283_v23 }
 0x251   :  { %377 = vmatmul.msk.f32.vlgmr.msrb.gmra.mxu2 %vm46_vm0, %v284_v24 }
 0x2d4   :  { %v314_v29 = vpop.f32.mrf.mxu2 }
 0x2d5   :  { %v315_v30 = vadd.f32 %v394_v28, %v314_v29 }
 0x2d7   :  { %v317_v31 = vmax.f32 %v315_v30, 0.0 }
 0x2d9   :  { %378 = vmatmul.msk.f32.vlgmr.msra.gmra.mxu3 %vm46_vm0, %v317_v31 }
 0x35c   :  { %v346_v33 = vpop.f32.mrf.mxu3 }
 0x35d   :  { %v347_v34 = vadd.f32 %v395_v32, %v346_v33 }
 0x35f   :  { %v349_v35 = vmax.f32 %v347_v34, 0.0 }
 0x361   :  { %351 = vst.msk [vmem:[#allocation2] sm:$0x3] %vm350_vm1, %v349_v35 }
 0x362   :  { %362 = dma.vmem_to_hbm [thread:$0]  %s358_s12, 32, %s360_s11, [#allocation3]  }
 0x363   :  { %440 = dma.done.wait [#allocation3], 32  }
 0x364   :  { %441 = vsyncadd [#allocation3], 4294967264 }
 0x365   :  { %371 = vsyncpa [#allocation3], 1 }

</bundles_post_ra>
